<compile_context>
chip_gen: v5e
topology: v5e:2x2
jax: 0.10.0
libtpu: 0.0.40
codegen_flags: <defaults>
</compile_context>

<pallas_src>
import functools

import jax
import jax.numpy as jnp
from jax.experimental import pallas as pl
from jax.experimental.pallas import tpu as pltpu


def _round_up(x, m):
    return ((x + m - 1) // m) * m


def _sigmoid(z):
    # 1/(1+exp(-z)); safe for large |z| in f32 (exp overflow -> inf -> 0).
    return 1.0 / (1.0 + jnp.exp(-z))


# activation_fn is a constructor argument of the PyTorch module; support a few
# common choices at trace time (default "relu").
_ACTIVATIONS = {
    "relu": lambda h: jnp.maximum(h, 0.0),
    "tanh": jnp.tanh,
    "mish": lambda h: h * jnp.tanh(jnp.logaddexp(h, 0.0)),
    "sigmoid": _sigmoid,
}


def _classification_kernel(x_ref, w1_ref, b1_ref, w2_ref, b2_ref, o_ref, *,
                           activation):
    # ----- fc1: [TB, D] @ [D, Hp] on the MXU ---------------------------------
    # bf16 cast done here (rides a VALU slot) instead of a separate XLA pass.
    x = x_ref[...].astype(jnp.bfloat16)
    h = jnp.dot(x, w1_ref[...], preferred_element_type=jnp.float32)   # [TB, Hp]
    h = h + b1_ref[...]                      # b1: [1, Hp] f32 (broadcast)

    # ----- activation (f32 on VPU/EUP; correct on v5e too) --------------------
    h = _ACTIVATIONS[activation](h)

    # ----- Dropout: identity in eval mode -------------------------------------
    # TODO(synk): training-mode dropout masking (pltpu.prng_*) not implemented.

    # ----- fc2 (out_features = 1), lane-dense --------------------------------
    # Transpose h on the XLU (both dims are x128-aligned) and contract with the
    # resident w2 rows on the MXU: result is a lane-major (·, TB) logits slab.
    # w2 is stored as (8, Hp): real weights in row 0, zeros elsewhere, so the
    # matmul M-dim is sublane-native; padded hidden columns contribute 0.
    h_t = h.T                                                          # [Hp, TB]
    logits8 = jnp.dot(w2_ref[...], h_t,
                      preferred_element_type=jnp.float32)              # [8, TB]
    logits = logits8[0:1, :] + b2_ref[0, 0]                            # [1, TB]

    # ----- output activation: Sigmoid; unmasked lane-dense store --------------
    o_ref[0] = _sigmoid(logits).astype(o_ref.dtype)


def _vmem_limit_bytes():
    # v5e/v6e: 128 MiB VMEM/core, v7x: 64 MiB.  Leave headroom for compiler
    # scratch on whichever part we are running on.
    try:
        cap = pltpu.get_tpu_info().vmem_capacity_bytes
    except Exception:
        cap = 64 * 1024 * 1024
    return int(max(32 * 1024 * 1024,
                   min(cap - 16 * 1024 * 1024, 96 * 1024 * 1024)))


def _choose_tile_rows(batch, d_in, hp, vmem_budget_bytes=32 * 1024 * 1024):
    """Rows of x per grid step, sized against a v7x-safe VMEM budget."""
    # Per batch row: double-buffered f32 x tile (2*4*D) + f32 hidden activations,
    # their transpose and fused temporaries (~3*4*Hp).
    per_row = 8 * d_in + 12 * hp
    weights = 4 * d_in * hp            # double-buffered bf16 w1
    # TODO(synk): for very large D*Hp add a K grid axis (reduction last,
    # "arbitrary") instead of shrinking the tile.
    tb = (vmem_budget_bytes - weights) // max(per_row, 1)
    tb = max(256, min(tb, 8192))       # >=~1-2 MiB of x/step, cap intermediates
    tb = (tb // 128) * 128             # keep output lanes / transpose x128-clean
    tb = min(tb, _round_up(batch, 128))
    return max(tb, 128)


def classification_nn_forward(x, params, *, activation="relu"):
    """ClassificationNN forward pass (eval mode).

    x: [B, input_size] float32 (or bfloat16).  Returns [B, 1] float32.
    """
    x = jnp.asarray(x)
    if x.dtype not in (jnp.float32, jnp.bfloat16):
        x = x.astype(jnp.float32)
    B, D = x.shape
    H = params["w1"].shape[1]

    # ---- lane-dense hidden: pad H to a multiple of 128 (zero cols) -----------
    Hp = max(128, _round_up(H, 128))
    w1 = jnp.pad(params["w1"].astype(jnp.bfloat16), ((0, 0), (0, Hp - H)))
    b1 = jnp.pad(params["b1"].reshape(1, H).astype(jnp.float32),
                 ((0, 0), (0, Hp - H)))
    # w2 as an (8, Hp) slab: row 0 = weights, rows 1..7 = 0 (native MXU M-dim).
    w2 = jnp.pad(params["w2"].reshape(1, H).astype(jnp.float32),
                 ((0, 7), (0, Hp - H)))
    b2 = params["b2"].reshape(1, 1).astype(jnp.float32)

    # ---- batch grid: x streamed unpadded; ragged last tile handled by Pallas -
    TB = _choose_tile_rows(B, D, Hp)
    nb = pl.cdiv(B, TB)

    kernel = functools.partial(_classification_kernel, activation=activation)

    out = pl.pallas_call(
        kernel,
        out_shape=jax.ShapeDtypeStruct((nb, 1, TB), jnp.float32),
        grid_spec=pltpu.PrefetchScalarGridSpec(
            num_scalar_prefetch=0,
            grid=(nb,),
            in_specs=[
                pl.BlockSpec((TB, D), lambda i: (i, 0)),   # x: streamed per tile
                pl.BlockSpec((D, Hp), lambda i: (0, 0)),   # w1: resident
                pl.BlockSpec((1, Hp), lambda i: (0, 0)),   # b1: resident
                pl.BlockSpec((8, Hp), lambda i: (0, 0)),   # w2 rows: resident
                pl.BlockSpec(memory_space=pltpu.MemorySpace.SMEM),  # b2 scalar
            ],
            out_specs=pl.BlockSpec((1, 1, TB), lambda i: (i, 0, 0)),
        ),
        compiler_params=pltpu.CompilerParams(
            dimension_semantics=("parallel",),             # batch rows independent
            vmem_limit_bytes=_vmem_limit_bytes(),
        ),
    )(x, w1, b1, w2, b2)

    # Flatten the lane-dense slab back to a [B, 1] column; garbage rows from the
    # ragged last tile are sliced off here.
    return out.reshape(-1)[:B].reshape(B, 1)


def init_params(key, input_size, hidden_size, init_type="xavier"):
    """Matches the PyTorch _initialize_weights (weights stored as [in, out])."""
    k1, k2 = jax.random.split(key)
    if init_type == "xavier":
        lim1 = (6.0 / (input_size + hidden_size)) ** 0.5
        lim2 = (6.0 / (hidden_size + 1)) ** 0.5
    elif init_type == "he":
        lim1 = (6.0 / input_size) ** 0.5
        lim2 = (6.0 / hidden_size) ** 0.5
    else:
        raise ValueError(f"Unknown init_type: {init_type}")
    return {
        "w1": jax.random.uniform(k1, (input_size, hidden_size), jnp.float32,
                                 -lim1, lim1),
        "b1": jnp.zeros((hidden_size,), jnp.float32),
        "w2": jax.random.uniform(k2, (hidden_size, 1), jnp.float32,
                                 -lim2, lim2),
        "b2": jnp.zeros((1,), jnp.float32),
    }


def reference_forward(x, params, activation="relu"):
    h = x @ params["w1"] + params["b1"]
    h = _ACTIVATIONS[activation](h)
    logits = h @ params["w2"] + params["b2"]
    return _sigmoid(logits)


if __name__ == "__main__":
    # Small shapes consistent with the module: batch=2, input_size=64, hidden=32.
    B, input_size, hidden_size = 2, 64, 32

    key = jax.random.PRNGKey(0)
    kx, kp = jax.random.split(key)
    x = jax.random.normal(kx, (B, input_size), jnp.float32)
    params = init_params(kp, input_size, hidden_size, init_type="xavier")

    out = classification_nn_forward(x, params, activation="relu")
    out = jax.block_until_ready(out)
    assert out.shape == (B, 1) and out.dtype == jnp.float32

    ref = reference_forward(x, params, activation="relu")
    assert jnp.allclose(out, ref, atol=5e-2, rtol=5e-2), (out, ref)

    print("KERNEL_OK")
</pallas_src>

<mosaic_0001>
module attributes {stable_mosaic.version = 11 : i64} {
  func.func @_classification_kernel(%arg0: i32, %arg1: memref<128x64xf32, #tpu.memory_space<vmem>>, %arg2: memref<64x128xbf16, #tpu.memory_space<vmem>>, %arg3: memref<1x128xf32, #tpu.memory_space<vmem>>, %arg4: memref<8x128xf32, #tpu.memory_space<vmem>>, %arg5: memref<1x1xf32, #tpu.memory_space<smem>>, %arg6: memref<1x1x128xf32, #tpu.memory_space<vmem>>) attributes {dimension_semantics = [#tpu.dimension_semantics<parallel>], iteration_bounds = array<i64: 1>, scalar_prefetch = 0 : i64, scratch_operands = 0 : i64, tpu.core_type = #tpu.core_type<tc>, window_params = [{transform_indices = @transform_0, window_bounds = array<i64: 128, 64>}, {pipeline_mode = #tpu.pipeline_mode<synchronous>, transform_indices = @transform_1, window_bounds = array<i64: 64, 128>}, {pipeline_mode = #tpu.pipeline_mode<synchronous>, transform_indices = @transform_2, window_bounds = array<i64: 1, 128>}, {pipeline_mode = #tpu.pipeline_mode<synchronous>, transform_indices = @transform_3, window_bounds = array<i64: 8, 128>}, {transform_indices = @transform_4, window_bounds = array<i64: 1, 1>}, {transform_indices = @transform_5, window_bounds = array<i64: 1, 1, 128>}]} {
    %c0 = arith.constant 0 : index
    %c0_0 = arith.constant 0 : index
    %0 = vector.load %arg1[%c0, %c0_0] : memref<128x64xf32, #tpu.memory_space<vmem>>, vector<128x64xf32>
    %1 = arith.truncf %0 : vector<128x64xf32> to vector<128x64xbf16>
    %c0_1 = arith.constant 0 : index
    %c0_2 = arith.constant 0 : index
    %2 = vector.load %arg2[%c0_1, %c0_2] : memref<64x128xbf16, #tpu.memory_space<vmem>>, vector<64x128xbf16>
    %cst = arith.constant dense<0.000000e+00> : vector<128x128xf32>
    %3 = tpu.matmul %1, %2, %cst {dimension_numbers = #tpu.dot_dimension_numbers<[1], [0], [0], [1], [0, 0, 1, 1], [], []>} : vector<128x64xbf16>, vector<64x128xbf16>, vector<128x128xf32> -> vector<128x128xf32>
    %c0_3 = arith.constant 0 : index
    %c0_4 = arith.constant 0 : index
    %4 = vector.load %arg3[%c0_3, %c0_4] : memref<1x128xf32, #tpu.memory_space<vmem>>, vector<1x128xf32>
    %5 = vector.broadcast %4 : vector<1x128xf32> to vector<128x128xf32>
    %6 = arith.addf %3, %5 : vector<128x128xf32>
    %cst_5 = arith.constant 0.000000e+00 : f32
    %7 = vector.broadcast %cst_5 : f32 to vector<128x128xf32>
    %8 = arith.maximumf %6, %7 : vector<128x128xf32>
    %9 = tpu.transpose %8, [1, 0] : vector<128x128xf32> -> vector<128x128xf32>
    %c0_6 = arith.constant 0 : index
    %c0_7 = arith.constant 0 : index
    %10 = vector.load %arg4[%c0_6, %c0_7] : memref<8x128xf32, #tpu.memory_space<vmem>>, vector<8x128xf32>
    %cst_8 = arith.constant dense<0.000000e+00> : vector<8x128xf32>
    %11 = tpu.matmul %10, %9, %cst_8 {dimension_numbers = #tpu.dot_dimension_numbers<[1], [0], [0], [1], [0, 0, 1, 1], [], []>} : vector<8x128xf32>, vector<128x128xf32>, vector<8x128xf32> -> vector<8x128xf32>
    %12 = vector.extract_strided_slice %11 {offsets = [0, 0], sizes = [1, 128], strides = [1, 1]} : vector<8x128xf32> to vector<1x128xf32>
    %c0_9 = arith.constant 0 : index
    %c0_10 = arith.constant 0 : index
    %13 = memref.load %arg5[%c0_9, %c0_10] : memref<1x1xf32, #tpu.memory_space<smem>>
    %14 = vector.broadcast %13 : f32 to vector<1x128xf32>
    %15 = arith.addf %12, %14 : vector<1x128xf32>
    %cst_11 = arith.constant 0.000000e+00 : f32
    %16 = vector.broadcast %cst_11 : f32 to vector<1x128xf32>
    %17 = arith.subf %16, %15 : vector<1x128xf32>
    %18 = math.exp %17 : vector<1x128xf32>
    %cst_12 = arith.constant 1.000000e+00 : f32
    %19 = vector.broadcast %cst_12 : f32 to vector<1x128xf32>
    %20 = arith.addf %19, %18 : vector<1x128xf32>
    %cst_13 = arith.constant 1.000000e+00 : f32
    %21 = vector.broadcast %cst_13 : f32 to vector<1x128xf32>
    %22 = arith.divf %21, %20 : vector<1x128xf32>
    %c0_14 = arith.constant 0 : index
    %c0_15 = arith.constant 0 : index
    %c0_16 = arith.constant 0 : index
    %23 = vector.load %arg6[%c0_14, %c0_15, %c0_16] : memref<1x1x128xf32, #tpu.memory_space<vmem>>, vector<1x1x128xf32>
    %24 = vector.shape_cast %23 : vector<1x1x128xf32> to vector<1x128xf32>
    %25 = vector.shape_cast %22 : vector<1x128xf32> to vector<1x1x128xf32>
    tpu.vector_store %arg6[%c0_14, %c0_15, %c0_16], %25 {strides = array<i32>} : memref<1x1x128xf32, #tpu.memory_space<vmem>>, vector<1x1x128xf32>,
    return
  }
  func.func @transform_0(%arg0: i32) -> (i32, i32) {
    %c0_i32 = arith.constant 0 : i32
    %c0_i32_0 = arith.constant 0 : i32
    return %arg0, %c0_i32 : i32, i32
  }
  func.func @transform_1(%arg0: i32) -> (i32, i32) {
    %c0_i32 = arith.constant 0 : i32
    %c0_i32_0 = arith.constant 0 : i32
    %c0_i32_1 = arith.constant 0 : i32
    return %c0_i32, %c0_i32_0 : i32, i32
  }
  func.func @transform_2(%arg0: i32) -> (i32, i32) {
    %c0_i32 = arith.constant 0 : i32
    %c0_i32_0 = arith.constant 0 : i32
    %c0_i32_1 = arith.constant 0 : i32
    return %c0_i32, %c0_i32_0 : i32, i32
  }
  func.func @transform_3(%arg0: i32) -> (i32, i32) {
    %c0_i32 = arith.constant 0 : i32
    %c0_i32_0 = arith.constant 0 : i32
    %c0_i32_1 = arith.constant 0 : i32
    return %c0_i32, %c0_i32_0 : i32, i32
  }
  func.func @transform_4(%arg0: i32) -> (i32, i32) {
    %c0_i32 = arith.constant 0 : i32
    %c0_i32_0 = arith.constant 0 : i32
    %c0_i32_1 = arith.constant 0 : i32
    return %c0_i32, %c0_i32_0 : i32, i32
  }
  func.func @transform_5(%arg0: i32) -> (i32, i32, i32) {
    %c0_i32 = arith.constant 0 : i32
    %c0_i32_0 = arith.constant 0 : i32
    %c0_i32_1 = arith.constant 0 : i32
    return %arg0, %c0_i32, %c0_i32_0 : i32, i32, i32
  }
}

</mosaic_0001>

<bundles_post_ra>
// kernel: tpu_custom_call.1
= control target key start
LH: loop header
LB: loop body
LE: loop exit
PB: predicated region body
PF: predicated region fallthrough
CT: control target
= control target key end

     0   :  { %11 = vsyncpa [#allocation4], 0  ;;  %s495_s0 = inlined_call_operand.vmem [shape: f32[2,64], index: 0, kind: input, shape index: {}]   ;;  %s496_s1 = inlined_call_operand.hbm [shape: bf16[64,128], index: 1, kind: input, shape index: {}]   ;;  %s497_s2 = inlined_call_operand.vmem [shape: f32[1,128], index: 2, kind: input, shape index: {}]   ;;  %s498_s3 = inlined_call_operand.hbm [shape: f32[8,128], index: 3, kind: input, shape index: {}]   ;;  %s499_s4 = inlined_call_operand.<no memory space> [shape: f32[1,1], index: 4, kind: input, shape index: {}]   ;;  %s500_s5 = inlined_call_operand.hbm [shape: f32[1,1,128], index: 5, kind: output, shape index: {}]  }
   0x1   :  { %12 = vsyncpa [#allocation7], 0 }
   0x2   :  { %13 = vsyncpa [#allocation5], 0  ;;  %s20_s20 = sshll.u32 %s496_s1, 4  ;;  %s389_s21 = smov [#allocation3]   ;;  %s21_s20 = int_to_ptr.hbm [resolvable:$true] %s20_s20 }
   0x3   :  { %s22_s22 = sshll.u32 %s389_s21, 4  ;;  %s36_s25 = sshll.u32 %s498_s3, 4  ;;  %s23_s22 = int_to_ptr.vmem [resolvable:$true] %s22_s22  ;;  %s37_s25 = int_to_ptr.hbm [resolvable:$true] %s36_s25 }
   0x4   :  { %s390_s26 = smov 64   ;;  %s391_s27 = smov 4  }
   0x5   :  { %28 = dma.hbm_to_vmem [thread:$0]  %s21_s20, 512, %s23_s22, [#allocation4], %s390_s26, %s390_s26, %s391_s27  }
   0x6   :  { %s392_s28 = smov [#allocation6]  }
   0x7   :  { %s38_s29 = sshll.u32 %s392_s28, 4  ;;  %s39_s29 = int_to_ptr.vmem [resolvable:$true] %s38_s29 }
   0x8   :  { %41 = dma.hbm_to_vmem [thread:$0]  %s37_s25, 128, %s39_s29, [#allocation7]  }
   0x9   :  { %383 = dma.done.wait [#allocation4], 512  }
   0xa   :  { %384 = vsyncadd [#allocation4], 4294966784 }
   0xb   :  { %385 = dma.done.wait [#allocation7], 128  }
   0xc   :  { %386 = vsyncadd [#allocation7], 4294967168  ;;  %v292_v0 = vld [vmem:[#allocation3 + $0x18] sm:$0xff]  ;;  %v291_v1 = vld [vmem:[#allocation3 + $0x10] sm:$0xff]  ;;  %vm113_vm0 = vcmask 523264   ;;  %s393_s10 = smov [#allocation8]  }
   0xd   :  { %293 = vmatpush.bf16.msra.mxu2 %v292_v0  ;;  %294 = vmatpush.bf16.msra.mxu3 %v292_v0  ;;  %v290_v2 = vld [vmem:[#allocation3 + $0x8] sm:$0xff]  ;;  %v289_v3 = vld [vmem:[#allocation3] sm:$0xff]  ;;  %v59_v4 = vld [vmem:[%s495_s0 + $0x30] sm:$0xff]  ;;  %s252_s11 = sshll.u32 %s393_s10, 4  ;;  %s253_s11 = int_to_ptr.vmem [resolvable:$true] %s252_s11 }
   0xe   :  { %142 = vmatpush.bf16.msra.mxu0 %v292_v0  ;;  %v60_v5 = vld [vmem:[%s495_s0 + $0x38] sm:$0xff]  ;;  %v65_v6 = vld [vmem:[%s495_s0 + $0x60] sm:$0xff]  ;;  %v66_v7 = vld [vmem:[%s495_s0 + $0x68] sm:$0xff] }
   0xf   :  { %v53_v8 = vld [vmem:[%s495_s0] sm:$0xff]  ;;  %v54_v9 = vld [vmem:[%s495_s0 + $0x8] sm:$0xff]  ;;  %v72_v10 = vpack.c.bf16 %v60_v5, %v59_v4  ;;  %v75_v11 = vpack.c.bf16 %v66_v7, %v65_v6  ;;  %v67_v15 = vld [vmem:[%s495_s0 + $0x70] sm:$0xff] }
  0x10   :  { %v69_v12 = vpack.c.bf16 %v54_v9, %v53_v8  ;;  %v61_v13 = vld [vmem:[%s495_s0 + $0x40] sm:$0xff]  ;;  %v62_v14 = vld [vmem:[%s495_s0 + $0x48] sm:$0xff]  ;;  %v68_v16 = vld [vmem:[%s495_s0 + $0x78] sm:$0xff] }
  0x11   :  { %295 = vmatpush.bf16.msra.mxu2 %v291_v1  ;;  %296 = vmatpush.bf16.msra.mxu3 %v291_v1  ;;  %v55_v17 = vld [vmem:[%s495_s0 + $0x10] sm:$0xff]  ;;  %v56_v18 = vld [vmem:[%s495_s0 + $0x18] sm:$0xff]  ;;  %v73_v19 = vpack.c.bf16 %v62_v14, %v61_v13  ;;  %v76_v20 = vpack.c.bf16 %v68_v16, %v67_v15  ;;  %v57_v24 = vld [vmem:[%s495_s0 + $0x20] sm:$0xff]  ;;  %v225_v14 = vstv %s499_s4  ;;  %s254_s4 = sshll.u32 %s500_s5, 4  ;;  %s255_s4 = int_to_ptr.hbm [resolvable:$true] %s254_s4 }
  0x12   :  { %143 = vmatpush.bf16.msra.mxu0 %v291_v1  ;;  %v70_v21 = vpack.c.bf16 %v56_v18, %v55_v17  ;;  %v63_v22 = vld [vmem:[%s495_s0 + $0x50] sm:$0xff]  ;;  %v64_v23 = vld [vmem:[%s495_s0 + $0x58] sm:$0xff]  ;;  %v58_v25 = vld [vmem:[%s495_s0 + $0x28] sm:$0xff] }
  0x13   :  { %v74_v26 = vpack.c.bf16 %v64_v23, %v63_v22  ;;  %v71_v27 = vpack.c.bf16 %v58_v25, %v57_v24  ;;  %v306_v36 = vld [vmem:[%s497_s2] ss:$0 sm:$0xff] }
  0x14   :  { %v203_v13 = vld [vmem:[#allocation6] sm:$0xff] }
  0x15   :  { %297 = vmatpush.bf16.msra.mxu2 %v290_v2  ;;  %298 = vmatpush.bf16.msra.mxu3 %v290_v2 }
  0x16   :  { %144 = vmatpush.bf16.msra.mxu0 %v290_v2 }
  0x19   :  { %299 = vmatpush.bf16.msra.mxu2 %v289_v3  ;;  %300 = vmatpush.bf16.msra.mxu3 %v289_v3 }
  0x1a   :  { %145 = vmatpush.bf16.msra.mxu0 %v289_v3 }
  0x1c   :  { %284 = vmatmul.msk.bf16.vlgmr.msra.gmra.mxu2 %vm113_vm0, %v72_v10  ;;  %287 = vmatmul.msk.bf16.vlgmr.msra.gmra.mxu3 %vm113_vm0, %v75_v11 }
  0x1d   :  { %281 = vmatmul.msk.bf16.vlgmr.msra.gmra.mxu0 %vm113_vm0, %v69_v12 }
  0x2c   :  { %285 = vmatmul.msk.bf16.gmra.mxu2 %vm113_vm0, %v73_v19  ;;  %288 = vmatmul.msk.bf16.gmra.mxu3 %vm113_vm0, %v76_v20 }
  0x2d   :  { %282 = vmatmul.msk.bf16.gmra.mxu0 %vm113_vm0, %v70_v21 }
  0x3c   :  { %286 = vmatmul.msk.bf16.gmra.mxu2 %vm113_vm0, %v74_v26 }
  0x3d   :  { %283 = vmatmul.msk.bf16.gmra.mxu0 %vm113_vm0, %v71_v27 }
  0x9a   :  { %v147_v32 = vpop.f32.mrf.mxu0 }
  0x9b   :  { %v148_v10 = vadd.f32 %v306_v36, %v147_v32 }
  0x9d   :  { %v187_v12 = vmax.f32 %v148_v10, 0.0 }
  0x9f   :  { %v162_v28 = vpop.f32.mrf.mxu2  ;;  %v177_v29 = vpop.f32.mrf.mxu3 }
  0xa0   :  { %v178_v46 = vadd.f32 %v306_v36, %v177_v29  ;;  %v163_v61 = vadd.f32 %v306_v36, %v162_v28 }
  0xa2   :  { %v149_v35 = vpop.f32.mrf.mxu0  ;;  %v199_v48 = vmax.f32 %v178_v46, 0.0  ;;  %v193_v0 = vmax.f32 %v163_v61, 0.0 }
  0xa3   :  { %v150_v8 = vadd.f32 %v306_v36, %v149_v35 }
  0xa5   :  { %v188_v11 = vmax.f32 %v150_v8, 0.0 }
  0xa7   :  { %v164_v30 = vpop.f32.mrf.mxu2  ;;  %v179_v31 = vpop.f32.mrf.mxu3 }
  0xa8   :  { %v180_v43 = vadd.f32 %v306_v36, %v179_v31  ;;  %v165_v59 = vadd.f32 %v306_v36, %v164_v30 }
  0xaa   :  { %v152_v42 = vpop.f32.mrf.mxu0  ;;  %v200_v47 = vmax.f32 %v180_v43, 0.0  ;;  %v194_v62 = vmax.f32 %v165_v59, 0.0 }
  0xab   :  { %v153_v6 = vadd.f32 %v306_v36, %v152_v42 }
  0xad   :  { %v189_v9 = vmax.f32 %v153_v6, 0.0 }
  0xaf   :  { %v167_v33 = vpop.f32.mrf.mxu2  ;;  %v182_v34 = vpop.f32.mrf.mxu3 }
  0xb0   :  { %v183_v40 = vadd.f32 %v306_v36, %v182_v34  ;;  %v168_v57 = vadd.f32 %v306_v36, %v167_v33 }
  0xb2   :  { %v201_v44 = vmax.f32 %v183_v40, 0.0  ;;  %v154_v49 = vpop.f32.mrf.mxu0  ;;  %v195_v60 = vmax.f32 %v168_v57, 0.0 }
  0xb3   :  { %v155_v4 = vadd.f32 %v306_v36, %v154_v49 }
  0xb5   :  { %v190_v7 = vmax.f32 %v155_v4, 0.0 }
  0xb7   :  { %v169_v37 = vpop.f32.mrf.mxu2  ;;  %v184_v38 = vpop.f32.mrf.mxu3 }
  0xb8   :  { %v185_v39 = vadd.f32 %v306_v36, %v184_v38  ;;  %v170_v54 = vadd.f32 %v306_v36, %v169_v37 }
  0xba   :  { %v202_v41 = vmax.f32 %v185_v39, 0.0  ;;  %v157_v56 = vpop.f32.mrf.mxu0  ;;  %v196_v58 = vmax.f32 %v170_v54, 0.0 }
  0xbb   :  { %v158_v2 = vadd.f32 %v306_v36, %v157_v56 }
  0xbc   :  { %204 = vmatpush.xpose.msra.mxu1 %v202_v41 }
  0xbd   :  { %v191_v5 = vmax.f32 %v158_v2, 0.0 }
  0xbf   :  { %v172_v45 = vpop.f32.mrf.mxu2 }
  0xc0   :  { %205 = vmatpush.xpose.msra.mxu1 %v201_v44  ;;  %v173_v52 = vadd.f32 %v306_v36, %v172_v45 }
  0xc2   :  { %v197_v55 = vmax.f32 %v173_v52, 0.0  ;;  %v159_v63 = vpop.f32.mrf.mxu0 }
  0xc3   :  { %v160_v1 = vadd.f32 %v306_v36, %v159_v63 }
  0xc4   :  { %206 = vmatpush.xpose.msra.mxu1 %v200_v47 }
  0xc5   :  { %v192_v3 = vmax.f32 %v160_v1, 0.0 }
  0xc7   :  { %v174_v50 = vpop.f32.mrf.mxu2 }
  0xc8   :  { %v175_v51 = vadd.f32 %v306_v36, %v174_v50  ;;  %207 = vmatpush.xpose.msra.mxu1 %v199_v48 }
  0xca   :  { %v198_v53 = vmax.f32 %v175_v51, 0.0 }
  0xcc   :  { %208 = vmatpush.xpose.msra.mxu1 %v198_v53 }
  0xd0   :  { %209 = vmatpush.xpose.msra.mxu1 %v197_v55 }
  0xd4   :  { %210 = vmatpush.xpose.msra.mxu1 %v196_v58 }
  0xd8   :  { %211 = vmatpush.xpose.msra.mxu1 %v195_v60 }
  0xdc   :  { %212 = vmatpush.xpose.msra.mxu1 %v194_v62 }
  0xe0   :  { %213 = vmatpush.xpose.msra.mxu1 %v193_v0 }
  0xe4   :  { %214 = vmatpush.xpose.msra.mxu1 %v192_v3 }
  0xe8   :  { %215 = vmatpush.xpose.msra.mxu1 %v191_v5 }
  0xec   :  { %216 = vmatpush.xpose.msra.mxu1 %v190_v7 }
  0xf0   :  { %217 = vmatpush.xpose.msra.mxu1 %v189_v9 }
  0xf4   :  { %218 = vmatpush.xpose.msra.mxu1 %v188_v11 }
  0xf8   :  { %219 = vmatpush.xpose.msra.mxu1 %v187_v12 }
  0xfb   :  { %220 = vmatmul.f32.vlgmr.msra.gmra.mxu1 %v203_v13 }
 0x178   :  { %v221_v15 = vpop.f32.mrf.mxu1 }
 0x179   :  { %v226_v16 = vadd.f32 %v225_v14, %v221_v15 }
 0x17b   :  { %v227_v17 = vsub.f32 0.0, %v226_v16 }
 0x17d   :  { %v228_v18 = vmul.f32 1.442695, %v227_v17 }
 0x17f   :  { %307 = vpow2.f32 %v228_v18 }
 0x185   :  { %v308_v19 = vpop.eup %307 }
 0x186   :  { %v230_v20 = vadd.f32 1.0, %v308_v19 }
 0x188   :  { %309 = vrcp.f32 %v230_v20  ;;  %v242_v24 = vand.u32 2147483648, %v230_v20  ;;  %v240_v26 = vand.u32 2147483647, %v230_v20  ;;  %vm236_vm2 = vweird.f32 %v230_v20 }
 0x18a   :  { %v243_v28 = vor.u32 1.1754944e-38, %v242_v24  ;;  %vm241_vm4 = vcmp.eq.f32.partialorder %v240_v26, 8.507059e+37 }
 0x18e   :  { %v310_v21 = vpop.eup %309 }
 0x18f   :  { %v232_v22 = vmul.f32 %v310_v21, %v230_v20  ;;  %vm237_vm1 = vweird.f32 %v310_v21 }
 0x190   :  { %vm238_vm3 = vmor %vm236_vm2, %vm237_vm1 }
 0x191   :  { %v233_v23 = vsub.f32 1.0, %v232_v22 }
 0x193   :  { %v234_v25 = vmul.f32 %v310_v21, %v233_v23 }
 0x195   :  { %v235_v27 = vadd.f32 %v310_v21, %v234_v25 }
 0x197   :  { %v239_v29 = vsel %vm238_vm3, %v310_v21, %v235_v27 }
 0x198   :  { %v244_v30 = vsel %vm241_vm4, %v243_v28, %v239_v29 }
 0x199   :  { %246 = vst [vmem:[#allocation8] sm:$0x1] %v244_v30 }
 0x19a   :  { %257 = dma.vmem_to_hbm [thread:$0]  %s253_s11, 16, %s255_s4, [#allocation5]  }
 0x19b   :  { %387 = dma.done.wait [#allocation5], 16  }
 0x19c   :  { %388 = vsyncadd [#allocation5], 4294967280 }
 0x19d   :  { %262 = vsyncpa [#allocation4], 1 }
 0x19e   :  { %263 = vsyncpa [#allocation7], 1 }
 0x19f   :  { %264 = vsyncpa [#allocation5], 1 }

</bundles_post_ra>
